<compile_context>
chip_gen: v6e
topology: v6e:2x2x1
jax: 0.10.0
libtpu: 0.0.40
codegen_flags: <defaults>
</compile_context>

<pallas_src>
import jax
import jax.numpy as jnp
from jax.experimental import pallas as pl
from jax.experimental.pallas import tpu as pltpu

_LANE = 128


def _normalizer_kernel(x_ref, ms_ref, o_ref):
    # x_ref / o_ref: (R, BD) VMEM tiles.
    # ms_ref: (2, R, 1) packed [mu; inv_std], broadcast across lanes by the VPU.
    mu = ms_ref[0]         # (R, 1)
    inv_std = ms_ref[1]    # (R, 1)
    o_ref[...] = ((x_ref[...] - mu) * inv_std).astype(o_ref.dtype)


def _round_down(v, m):
    return (v // m) * m


def _choose_blocks(rows, d, itemsize, *, vmem_budget_bytes,
                   min_row_blocks, min_split_tile_bytes):
    """Pick (row_block R, lane_block BD) so live VMEM (x + out + packed mu/std,
    lane-padded, double-buffered) stays under vmem_budget_bytes."""
    sub = max(8, 32 // max(1, itemsize))          # dtype-aware sublane quantum
    d_pad = -(-d // _LANE) * _LANE                # lane padding for VMEM sizing
    # live bytes per tile-row: (x + out) lane-padded + packed (mu, inv_std) f32,
    # all double-buffered.
    per_row = 2 * (2 * d_pad * itemsize + 2 * _LANE * 4)
    max_rows = vmem_budget_bytes // per_row

    if max_rows >= min(rows, sub):
        # Row blocking only; keep the full lane width.
        bd = d
        if rows <= sub:
            r = rows                               # full-dim block is allowed
        else:
            r = max(sub, _round_down(min(max_rows, rows), sub))
            # v7x: keep >= min_row_blocks grid steps (2 TCs) when the resulting
            # tiles are still large enough to amortize the per-step overhead.
            split_r = _round_down(rows // min_row_blocks, sub)
            if split_r >= sub and split_r * d * itemsize >= min_split_tile_bytes:
                r = min(r, split_r)
        return r, bd

    # Huge H*W fallback: block the lane axis in multiples of 128.
    r = rows if rows <= sub else sub
    fixed = 2 * 2 * r * _LANE * 4                  # packed mu/inv_std tiles
    per_lane = 2 * 2 * r * itemsize                # x + out per lane column
    bd = _round_down(max(_LANE, (vmem_budget_bytes - fixed) // per_lane), _LANE)
    if bd >= d:
        bd = d
    return r, bd


def normalizer(x, mu, log_var, *, vmem_budget_bytes=24 << 20, donate_x=False):
    """(x - mu) / exp(log_var / 2) with per-channel mu / log_var.

    x:       (N, C, H, W)          NCHW
    mu:      (C,) or (C, 1, 1)     (PyTorch buffer `mu`)
    log_var: (C,) or (C, 1, 1)     (== 2 * log(std))
    """
    N, C, H, W = x.shape
    rows = N * C
    D = H * W

    mu_c = jnp.reshape(mu, (-1,)).astype(jnp.float32)                 # (C,)
    inv_std_c = jnp.exp(-0.5 * jnp.reshape(log_var, (-1,)).astype(jnp.float32))

    # One (mu, inv_std) pair per row of the flattened (N*C, H*W) view, packed
    # into a single operand: (2, rows, 1) kept in f32 for precision.
    ms = jnp.stack([jnp.tile(mu_c, N), jnp.tile(inv_std_c, N)], axis=0)
    ms = ms.reshape(2, rows, 1)

    x2 = x.reshape(rows, D)                                            # free for NCHW

    R, BD = _choose_blocks(rows, D, x.dtype.itemsize,
                           vmem_budget_bytes=vmem_budget_bytes,
                           min_row_blocks=4,
                           min_split_tile_bytes=512 * 1024)
    grid = (pl.cdiv(rows, R), pl.cdiv(D, BD))

    out2 = pl.pallas_call(
        _normalizer_kernel,
        out_shape=jax.ShapeDtypeStruct((rows, D), x.dtype),
        grid=grid,
        in_specs=[
            pl.BlockSpec((R, BD), lambda i, j: (i, j)),      # x rows (lane-dense)
            pl.BlockSpec((2, R, 1), lambda i, j: (0, i, 0)),  # packed mu / inv_std
        ],
        out_specs=pl.BlockSpec((R, BD), lambda i, j: (i, j)),
        compiler_params=pltpu.CompilerParams(
            dimension_semantics=("parallel", "parallel"),
            vmem_limit_bytes=32 << 20),
        input_output_aliases=({0: 0} if donate_x else {}),
    )(x2, ms)

    return out2.reshape(N, C, H, W)


if __name__ == "__main__":
    key = jax.random.PRNGKey(0)
    kx, kmu, kstd = jax.random.split(key, 3)

    N, C, H, W = 2, 4, 16, 16
    x = jax.random.normal(kx, (N, C, H, W), dtype=jnp.float32)

    # Deterministic synthetic "buffers" (mirrors register_buffer('mu', mu)
    # and register_buffer('log_var', 2 * log(std)) in __init__).
    mu = jax.random.normal(kmu, (C,), dtype=jnp.float32)
    std = jax.random.uniform(kstd, (C,), dtype=jnp.float32,
                             minval=0.5, maxval=2.0)
    log_var = 2.0 * jnp.log(std)

    out = normalizer(x, mu, log_var)
    out = jax.block_until_ready(out)

    # Reference (plain JAX) check of the exact module semantics.
    ref = (x - mu[None, :, None, None]) / jnp.exp(
        log_var[None, :, None, None] / 2.0)
    assert out.shape == x.shape and out.dtype == x.dtype
    assert jnp.allclose(out, ref, atol=1e-6, rtol=1e-6)

    print("KERNEL_OK")
</pallas_src>

<mosaic_0001>
module attributes {stable_mosaic.version = 11 : i64} {
  func.func @_normalizer_kernel(%arg0: i32, %arg1: i32, %arg2: memref<8x256xf32, #tpu.memory_space<vmem>>, %arg3: memref<2x8x1xf32, #tpu.memory_space<vmem>>, %arg4: memref<8x256xf32, #tpu.memory_space<vmem>>) attributes {dimension_semantics = [#tpu.dimension_semantics<parallel>, #tpu.dimension_semantics<parallel>], iteration_bounds = array<i64: 1, 1>, scalar_prefetch = 0 : i64, scratch_operands = 0 : i64, tpu.core_type = #tpu.core_type<tc>, window_params = [{transform_indices = @transform_0, window_bounds = array<i64: 8, 256>}, {transform_indices = @transform_1, window_bounds = array<i64: 2, 8, 1>}, {transform_indices = @transform_2, window_bounds = array<i64: 8, 256>}]} {
    %c0 = arith.constant 0 : index
    %c0_0 = arith.constant 0 : index
    %c0_1 = arith.constant 0 : index
    %0 = vector.load %arg3[%c0, %c0_0, %c0_1] : memref<2x8x1xf32, #tpu.memory_space<vmem>>, vector<1x8x1xf32>
    %1 = vector.shape_cast %0 : vector<1x8x1xf32> to vector<8x1xf32>
    %c1 = arith.constant 1 : index
    %c0_2 = arith.constant 0 : index
    %c0_3 = arith.constant 0 : index
    %2 = vector.load %arg3[%c1, %c0_2, %c0_3] : memref<2x8x1xf32, #tpu.memory_space<vmem>>, vector<1x8x1xf32>
    %3 = vector.shape_cast %2 : vector<1x8x1xf32> to vector<8x1xf32>
    %c0_4 = arith.constant 0 : index
    %c0_5 = arith.constant 0 : index
    %4 = vector.load %arg2[%c0_4, %c0_5] : memref<8x256xf32, #tpu.memory_space<vmem>>, vector<8x256xf32>
    %5 = vector.broadcast %1 : vector<8x1xf32> to vector<8x256xf32>
    %6 = arith.subf %4, %5 : vector<8x256xf32>
    %7 = vector.broadcast %3 : vector<8x1xf32> to vector<8x256xf32>
    %8 = arith.mulf %6, %7 : vector<8x256xf32>
    %c0_6 = arith.constant 0 : index
    %c0_7 = arith.constant 0 : index
    %9 = vector.load %arg4[%c0_6, %c0_7] : memref<8x256xf32, #tpu.memory_space<vmem>>, vector<8x256xf32>
    tpu.vector_store %arg4[%c0_6, %c0_7], %8 {strides = array<i32>} : memref<8x256xf32, #tpu.memory_space<vmem>>, vector<8x256xf32>,
    return
  }
  func.func @transform_0(%arg0: i32, %arg1: i32) -> (i32, i32) {
    %c0_i32 = arith.constant 0 : i32
    return %arg0, %arg1 : i32, i32
  }
  func.func @transform_1(%arg0: i32, %arg1: i32) -> (i32, i32, i32) {
    %c0_i32 = arith.constant 0 : i32
    %c0_i32_0 = arith.constant 0 : i32
    %c0_i32_1 = arith.constant 0 : i32
    return %c0_i32, %arg0, %c0_i32_0 : i32, i32, i32
  }
  func.func @transform_2(%arg0: i32, %arg1: i32) -> (i32, i32) {
    %c0_i32 = arith.constant 0 : i32
    return %arg0, %arg1 : i32, i32
  }
}

</mosaic_0001>

<bundles_post_ra>
// kernel: tpu_custom_call.1
= control target key start
LH: loop header
LB: loop body
LE: loop exit
PB: predicated region body
PF: predicated region fallthrough
CT: control target
= control target key end

     0   :  { %v73_v1 = vmov 0   ;;  %s105_s0 = inlined_call_operand.vmem [shape: f32[8,256], index: 0, kind: input, shape index: {}]   ;;  %s106_s1 = inlined_call_operand.vmem [shape: f32[2,8,1], index: 1, kind: input, shape index: {}]   ;;  %s107_s2 = inlined_call_operand.hbm [shape: f32[8,256], index: 2, kind: output, shape index: {}]  }
   0x1   :  { %v12_v0 = vld [vmem:[%s106_s1] sm:$0xff]  ;;  %50 = vset.pattern.permute.xlu0 %v73_v1 }
   0x2   :  { %7 = vsyncpa [#allocation3], 0  ;;  %19 = vperm.xlu0 %50, %v12_v0   ;;  %v47_v2 = vld [vmem:[%s106_s1 + $0x8] sm:$0xff]  ;;  %v15_v3 = vld [vmem:[%s105_s0] sm:$0xff]  ;;  %s74_s17 = smov [#allocation2]  }
   0x3   :  { %v16_v4 = vld [vmem:[%s105_s0 + $0x8] sm:$0xff]  ;;  %s39_s18 = sshll.u32 %s74_s17, 4  ;;  %s40_s18 = int_to_ptr.vmem [resolvable:$true] %s39_s18 }
   0x4   :  { %s51_s1 = scalar_lea.vmem %s40_s18, 256  ;;  %p56_p1 = scmp.lt.s32.totalorder %s40_s18, %s40_s18 }
   0x5   :  { %p52_p0 = scmp.ne.s32.totalorder %s40_s18, %s51_s1  ;;  %p57_p2 = scmp.lt.s32.totalorder %s51_s1, %s51_s1 }
   0x6   :  { %26 = vperm.xlu0 %50, %v47_v2  }
   0x7   :  { %p58_p3 = por %p57_p2, %p56_p1 }
   0x9   :  { %p59_p4 = pnand %p58_p3, %p52_p0 }
  0x7d   :  { %v20_v5 = vpop.permute.xlu0 %19 }
  0x7e   :  { %v22_v6 = vsub.f32 %v15_v3, %v20_v5  ;;  %v23_v7 = vsub.f32 %v16_v4, %v20_v5 }
  0x81   :  { %v27_v8 = vpop.permute.xlu0 %26 }
  0x82   :  { %v29_v9 = vmul.f32 %v27_v8, %v22_v6  ;;  %v30_v10 = vmul.f32 %v27_v8, %v23_v7 }
  0x84   :  { %31 = vst [vmem:[#allocation2] sm:$0xff] %v29_v9  ;;  %32 = vst [vmem:[#allocation2 + $0x8] sm:$0xff] %v30_v10 }
  0x85   :  { %62 = shalt.err (!%p59_p4)
}
  0x86   :  { %42 = dma.vmem_to_hbm [thread:$0]  %s40_s18, 256, %s107_s2, [#allocation3]  }
  0x87   :  { %71 = dma.done.wait [#allocation3], 256  }
  0x88   :  { %72 = vsyncadd [#allocation3], 4294967040 }
  0x89   :  { %46 = vsyncpa [#allocation3], 1 }

</bundles_post_ra>
